<compile_context>
chip_gen: v6e
topology: v6e:2x2x1
jax: 0.10.0
libtpu: 0.0.40
codegen_flags: <defaults>
</compile_context>

<pallas_src>
import functools
import math

import jax
import jax.numpy as jnp
from jax.experimental import pallas as pl
from jax.experimental.pallas import tpu as pltpu

_FMA_K_MAX = 8   # use VPU broadcast-FMA for the fc1 contraction when K <= this


def _round_up(x, m):
    return ((x + m - 1) // m) * m


def _cdiv(a, b):
    return (a + b - 1) // b


def actor_net_kernel(x_ref, w1_ref, b1_ref, w2_ref, b2_ref, wh_ref, bh_ref,
                     mask_ref, out_ref):
    cd = w2_ref.dtype                      # MXU input dtype (f32 or bf16)
    x = x_ref[...]
    tb, k_dim = x.shape
    fc1 = w1_ref.shape[1]

    # ---- fc1 + relu -------------------------------------------------------
    # K = state_dims is tiny (e.g. 4): a dot would waste >97% of the MXU
    # contraction dim and serialize a third MXU pass.  Do K broadcast FMAs on
    # the VPU instead (f32 everywhere; v5e has no bf16 VPU).
    if k_dim <= _FMA_K_MAX:
        h1 = jnp.zeros((tb, fc1), jnp.float32)
        for k in range(k_dim):
            xk = x[:, k:k + 1].astype(jnp.float32)        # (TB, 1)
            wk = w1_ref[k:k + 1, :].astype(jnp.float32)   # (1, fc1)
            h1 = h1 + xk * wk
    else:
        h1 = jnp.dot(x, w1_ref[...], preferred_element_type=jnp.float32)
    h1 = jnp.maximum(h1 + b1_ref[...], 0.0)

    # ---- fc2 + relu (MXU) -------------------------------------------------
    h2 = jnp.dot(h1.astype(cd), w2_ref[...],
                 preferred_element_type=jnp.float32)
    h2 = jnp.maximum(h2 + b2_ref[...], 0.0)

    # ---- fused mu / log_sigma heads (single MXU pass) ----------------------
    #   columns [0:A)    -> mean (unclamped)
    #   columns [A:2A)   -> std = exp(clamp(log_std, -20, 2))
    #   columns [2A:...) -> padding (lane-dense mode only; ignored by wrapper)
    heads = jnp.dot(h2.astype(cd), wh_ref[...],
                    preferred_element_type=jnp.float32) + bh_ref[...]
    std_vals = jnp.exp(jnp.clip(heads, -20.0, 2.0))
    is_std = mask_ref[...] != 0                             # (1, out_cols)
    out_ref[...] = jnp.where(is_std, std_vals, heads).astype(out_ref.dtype)


def pack_actor_params(params, *, lane_dense_output=False,
                      compute_dtype=jnp.float32):
    """One-time packing of raw per-layer params (call once per param update).

    lane_dense_output=False (default): head weight/bias/output use 2*A columns
      (narrow output, ~32x less output HBM writeback for A=2).
    lane_dense_output=True: pad head columns to a multiple of 128 (unmasked
      vector stores; small-batch latency mode).
    compute_dtype: jnp.float32 or jnp.bfloat16 (v6e/v7x).  Biases and the
      bias/ReLU/exp epilogue stay f32; dots accumulate in f32.
    """
    w1, b1, w2, b2, wmu, bmu, wls, bls = params
    A = wmu.shape[1]
    H = 2 * A
    out_cols = _round_up(H, 128) if lane_dense_output else H

    wh = jnp.concatenate([wmu, wls], axis=1)
    bh = jnp.concatenate([bmu, bls], axis=1)
    if out_cols != H:
        wh = jnp.pad(wh, ((0, 0), (0, out_cols - H)))
        bh = jnp.pad(bh, ((0, 0), (0, out_cols - H)))

    cols = jnp.arange(out_cols)
    mask = ((cols >= A) & (cols < H)).astype(jnp.int32).reshape(1, out_cols)

    cd = compute_dtype
    return dict(
        w1=w1.astype(cd), b1=b1.astype(jnp.float32),
        w2=w2.astype(cd), b2=b2.astype(jnp.float32),
        wh=wh.astype(cd), bh=bh.astype(jnp.float32),
        mask=mask,
        action_dims=A, out_cols=out_cols,
        compute_dtype=cd,
    )


def _choose_batch_tile(B, batch_tile, sublane):
    """Pick TB: <= batch_tile rows, multiple of `sublane`, and (when possible)
    an even number of grid steps with minimal padding (v7x megacore balance)."""
    if B <= 2 * sublane:
        return _round_up(B, sublane)
    n = max(2, _cdiv(B, batch_tile))
    if n % 2:
        n += 1
    return _round_up(_cdiv(B, n), sublane)


def actor_net_forward(x, packed, *, batch_tile=512):
    """Fused ActorNet forward.  x: (B, state_dims) float32.

    Returns (mean, std), each (B, action_dims) float32.
    """
    w1, b1 = packed["w1"], packed["b1"]
    w2, b2 = packed["w2"], packed["b2"]
    wh, bh = packed["wh"], packed["bh"]
    mask = packed["mask"]
    A = packed["action_dims"]
    out_cols = packed["out_cols"]
    cd = packed["compute_dtype"]

    B, state_dims = x.shape
    fc1_dims = w1.shape[1]
    fc2_dims = w2.shape[1]

    x = x.astype(cd)

    # --- Batch tiling (sublane-aligned; 16 for bf16 packing). ---------------
    sublane = 16 if jnp.dtype(cd) == jnp.dtype(jnp.bfloat16) else 8
    TB = _choose_batch_tile(B, batch_tile, sublane)
    B_pad = _cdiv(B, TB) * TB
    if B_pad != B:
        x = jnp.pad(x, ((0, B_pad - B), (0, 0)))
    grid = (B_pad // TB,)

    # Advisory cost estimate for XLA's scheduler.
    flops = 2 * B_pad * (state_dims * fc1_dims
                         + fc1_dims * fc2_dims
                         + fc2_dims * out_cols)
    w_itemsize = jnp.dtype(cd).itemsize
    bytes_accessed = (
        w_itemsize * (B_pad * state_dims + state_dims * fc1_dims
                      + fc1_dims * fc2_dims + fc2_dims * out_cols)
        + 4 * (B_pad * out_cols + fc1_dims + fc2_dims + 2 * out_cols))

    def const_spec(shape):
        # Weights/biases/mask: same block every grid step -> stay VMEM-resident.
        return pl.BlockSpec(shape, lambda i: (0, 0))

    out = pl.pallas_call(
        actor_net_kernel,
        out_shape=jax.ShapeDtypeStruct((B_pad, out_cols), jnp.float32),
        grid=grid,
        in_specs=[
            pl.BlockSpec((TB, state_dims), lambda i: (i, 0)),    # x tile
            const_spec((state_dims, fc1_dims)),                  # W1
            const_spec((1, fc1_dims)),                           # b1
            const_spec((fc1_dims, fc2_dims)),                    # W2
            const_spec((1, fc2_dims)),                           # b2
            const_spec((fc2_dims, out_cols)),                    # packed head W
            const_spec((1, out_cols)),                           # packed head b
            const_spec((1, out_cols)),                           # std-column mask
        ],
        out_specs=pl.BlockSpec((TB, out_cols), lambda i: (i, 0)),
        compiler_params=pltpu.CompilerParams(
            dimension_semantics=("parallel",)),
        cost_estimate=pl.CostEstimate(
            flops=int(flops),
            transcendentals=int(B_pad * out_cols),
            bytes_accessed=int(bytes_accessed)),
    )(x, w1, b1, w2, b2, wh, bh, mask)

    # Single slice of the slab, then split mean/std from the small slice.
    trimmed = out[:B, :2 * A]
    mean = trimmed[:, :A]
    std = trimmed[:, A:]
    return mean, std


def init_actor_params(key, state_dims, action_dims, fc1_dims=256, fc2_dims=256):
    """PyTorch-style uniform(+/- 1/sqrt(fan_in)) init.

    Weights stored as (in_features, out_features); biases as (1, out_features).
    """
    keys = jax.random.split(key, 8)

    def linear(kw, kb, fan_in, fan_out):
        bound = 1.0 / math.sqrt(fan_in)
        w = jax.random.uniform(kw, (fan_in, fan_out), jnp.float32, -bound, bound)
        b = jax.random.uniform(kb, (1, fan_out), jnp.float32, -bound, bound)
        return w, b

    w1, b1 = linear(keys[0], keys[1], state_dims, fc1_dims)
    w2, b2 = linear(keys[2], keys[3], fc1_dims, fc2_dims)
    wmu, bmu = linear(keys[4], keys[5], fc2_dims, action_dims)
    wls, bls = linear(keys[6], keys[7], fc2_dims, action_dims)
    return (w1, b1, w2, b2, wmu, bmu, wls, bls)


def actor_net_reference(x, params):
    """Plain-JAX (f32) reference implementation for verification."""
    w1, b1, w2, b2, wmu, bmu, wls, bls = params
    h1 = jnp.maximum(x @ w1 + b1, 0.0)
    h2 = jnp.maximum(h1 @ w2 + b2, 0.0)
    mean = h2 @ wmu + bmu
    log_std = jnp.clip(h2 @ wls + bls, -20.0, 2.0)
    return mean, jnp.exp(log_std)


def _check(x, packed, raw_params, A, atol=1e-4, rtol=1e-4):
    mean, std = actor_net_forward(x, packed)
    jax.block_until_ready((mean, std))
    mean_ref, std_ref = actor_net_reference(x, raw_params)
    assert mean.shape == (x.shape[0], A), mean.shape
    assert std.shape == (x.shape[0], A), std.shape
    assert jnp.allclose(mean, mean_ref, atol=atol, rtol=rtol)
    assert jnp.allclose(std, std_ref, atol=atol, rtol=rtol)
    assert bool(jnp.all(std > 0.0))


if __name__ == "__main__":
    # Small shapes consistent with a CartPole-style PPO actor.
    state_dims = 4
    action_dims = 2
    fc1_dims = 256
    fc2_dims = 256

    key = jax.random.PRNGKey(0)
    key_params, key_x1, key_x2 = jax.random.split(key, 3)
    params = init_actor_params(key_params, state_dims, action_dims,
                               fc1_dims, fc2_dims)

    # Pack once (per parameter update), not per forward call.
    packed_narrow = pack_actor_params(params)                        # default
    packed_wide = pack_actor_params(params, lane_dense_output=True)  # latency mode
    packed_bf16 = pack_actor_params(params, compute_dtype=jnp.bfloat16)

    # Small batch (single grid step).
    x_small = jax.random.normal(key_x1, (8, state_dims), dtype=jnp.float32)
    _check(x_small, packed_wide, params, action_dims)
    _check(x_small, packed_narrow, params, action_dims)

    # Larger, non-multiple batch: adaptive TB -> balanced 2-step grid + padding.
    x_big = jax.random.normal(key_x2, (300, state_dims), dtype=jnp.float32)
    _check(x_big, packed_narrow, params, action_dims)
    _check(x_big, packed_wide, params, action_dims)

    # bf16 weights/activations (v6e/v7x path), f32 accumulation: loose tolerance.
    _check(x_big, packed_bf16, params, action_dims, atol=3e-2, rtol=3e-2)

    print("KERNEL_OK")
</pallas_src>

<mosaic_0001>
module attributes {stable_mosaic.version = 11 : i64} {
  func.func @actor_net_kernel(%arg0: i32, %arg1: memref<8x4xf32, #tpu.memory_space<vmem>>, %arg2: memref<4x256xf32, #tpu.memory_space<vmem>>, %arg3: memref<1x256xf32, #tpu.memory_space<vmem>>, %arg4: memref<256x256xf32, #tpu.memory_space<vmem>>, %arg5: memref<1x256xf32, #tpu.memory_space<vmem>>, %arg6: memref<256x128xf32, #tpu.memory_space<vmem>>, %arg7: memref<1x128xf32, #tpu.memory_space<vmem>>, %arg8: memref<1x128xi32, #tpu.memory_space<vmem>>, %arg9: memref<8x128xf32, #tpu.memory_space<vmem>>) attributes {dimension_semantics = [#tpu.dimension_semantics<parallel>], iteration_bounds = array<i64: 1>, scalar_prefetch = 0 : i64, scratch_operands = 0 : i64, tpu.core_type = #tpu.core_type<tc>, window_params = [{transform_indices = @transform_0, window_bounds = array<i64: 8, 4>}, {pipeline_mode = #tpu.pipeline_mode<synchronous>, transform_indices = @transform_1, window_bounds = array<i64: 4, 256>}, {pipeline_mode = #tpu.pipeline_mode<synchronous>, transform_indices = @transform_2, window_bounds = array<i64: 1, 256>}, {pipeline_mode = #tpu.pipeline_mode<synchronous>, transform_indices = @transform_3, window_bounds = array<i64: 256, 256>}, {pipeline_mode = #tpu.pipeline_mode<synchronous>, transform_indices = @transform_4, window_bounds = array<i64: 1, 256>}, {pipeline_mode = #tpu.pipeline_mode<synchronous>, transform_indices = @transform_5, window_bounds = array<i64: 256, 128>}, {pipeline_mode = #tpu.pipeline_mode<synchronous>, transform_indices = @transform_6, window_bounds = array<i64: 1, 128>}, {pipeline_mode = #tpu.pipeline_mode<synchronous>, transform_indices = @transform_7, window_bounds = array<i64: 1, 128>}, {transform_indices = @transform_8, window_bounds = array<i64: 8, 128>}]} {
    %c0 = arith.constant 0 : index
    %c0_0 = arith.constant 0 : index
    %0 = vector.load %arg1[%c0, %c0_0] : memref<8x4xf32, #tpu.memory_space<vmem>>, vector<8x4xf32>
    %cst = arith.constant 0.000000e+00 : f32
    %1 = vector.broadcast %cst : f32 to vector<8x256xf32>
    %2 = vector.extract_strided_slice %0 {offsets = [0, 0], sizes = [8, 1], strides = [1, 1]} : vector<8x4xf32> to vector<8x1xf32>
    %c0_1 = arith.constant 0 : index
    %c0_2 = arith.constant 0 : index
    %3 = vector.load %arg2[%c0_1, %c0_2] : memref<4x256xf32, #tpu.memory_space<vmem>>, vector<1x256xf32>
    %4 = vector.broadcast %2 : vector<8x1xf32> to vector<8x256xf32>
    %5 = vector.broadcast %3 : vector<1x256xf32> to vector<8x256xf32>
    %6 = arith.mulf %4, %5 : vector<8x256xf32>
    %7 = arith.addf %1, %6 : vector<8x256xf32>
    %8 = vector.extract_strided_slice %0 {offsets = [0, 1], sizes = [8, 1], strides = [1, 1]} : vector<8x4xf32> to vector<8x1xf32>
    %c1 = arith.constant 1 : index
    %c0_3 = arith.constant 0 : index
    %9 = vector.load %arg2[%c1, %c0_3] : memref<4x256xf32, #tpu.memory_space<vmem>>, vector<1x256xf32>
    %10 = vector.broadcast %8 : vector<8x1xf32> to vector<8x256xf32>
    %11 = vector.broadcast %9 : vector<1x256xf32> to vector<8x256xf32>
    %12 = arith.mulf %10, %11 : vector<8x256xf32>
    %13 = arith.addf %7, %12 : vector<8x256xf32>
    %14 = vector.extract_strided_slice %0 {offsets = [0, 2], sizes = [8, 1], strides = [1, 1]} : vector<8x4xf32> to vector<8x1xf32>
    %c2 = arith.constant 2 : index
    %c0_4 = arith.constant 0 : index
    %15 = vector.load %arg2[%c2, %c0_4] : memref<4x256xf32, #tpu.memory_space<vmem>>, vector<1x256xf32>
    %16 = vector.broadcast %14 : vector<8x1xf32> to vector<8x256xf32>
    %17 = vector.broadcast %15 : vector<1x256xf32> to vector<8x256xf32>
    %18 = arith.mulf %16, %17 : vector<8x256xf32>
    %19 = arith.addf %13, %18 : vector<8x256xf32>
    %20 = vector.extract_strided_slice %0 {offsets = [0, 3], sizes = [8, 1], strides = [1, 1]} : vector<8x4xf32> to vector<8x1xf32>
    %c3 = arith.constant 3 : index
    %c0_5 = arith.constant 0 : index
    %21 = vector.load %arg2[%c3, %c0_5] : memref<4x256xf32, #tpu.memory_space<vmem>>, vector<1x256xf32>
    %22 = vector.broadcast %20 : vector<8x1xf32> to vector<8x256xf32>
    %23 = vector.broadcast %21 : vector<1x256xf32> to vector<8x256xf32>
    %24 = arith.mulf %22, %23 : vector<8x256xf32>
    %25 = arith.addf %19, %24 : vector<8x256xf32>
    %c0_6 = arith.constant 0 : index
    %c0_7 = arith.constant 0 : index
    %26 = vector.load %arg3[%c0_6, %c0_7] : memref<1x256xf32, #tpu.memory_space<vmem>>, vector<1x256xf32>
    %27 = vector.broadcast %26 : vector<1x256xf32> to vector<8x256xf32>
    %28 = arith.addf %25, %27 : vector<8x256xf32>
    %cst_8 = arith.constant 0.000000e+00 : f32
    %29 = vector.broadcast %cst_8 : f32 to vector<8x256xf32>
    %30 = arith.maximumf %28, %29 : vector<8x256xf32>
    %c0_9 = arith.constant 0 : index
    %c0_10 = arith.constant 0 : index
    %31 = vector.load %arg4[%c0_9, %c0_10] : memref<256x256xf32, #tpu.memory_space<vmem>>, vector<256x256xf32>
    %cst_11 = arith.constant dense<0.000000e+00> : vector<8x256xf32>
    %32 = tpu.matmul %30, %31, %cst_11 {dimension_numbers = #tpu.dot_dimension_numbers<[1], [0], [0], [1], [0, 0, 1, 1], [], []>} : vector<8x256xf32>, vector<256x256xf32>, vector<8x256xf32> -> vector<8x256xf32>
    %c0_12 = arith.constant 0 : index
    %c0_13 = arith.constant 0 : index
    %33 = vector.load %arg5[%c0_12, %c0_13] : memref<1x256xf32, #tpu.memory_space<vmem>>, vector<1x256xf32>
    %34 = vector.broadcast %33 : vector<1x256xf32> to vector<8x256xf32>
    %35 = arith.addf %32, %34 : vector<8x256xf32>
    %cst_14 = arith.constant 0.000000e+00 : f32
    %36 = vector.broadcast %cst_14 : f32 to vector<8x256xf32>
    %37 = arith.maximumf %35, %36 : vector<8x256xf32>
    %c0_15 = arith.constant 0 : index
    %c0_16 = arith.constant 0 : index
    %38 = vector.load %arg6[%c0_15, %c0_16] : memref<256x128xf32, #tpu.memory_space<vmem>>, vector<256x128xf32>
    %cst_17 = arith.constant dense<0.000000e+00> : vector<8x128xf32>
    %39 = tpu.matmul %37, %38, %cst_17 {dimension_numbers = #tpu.dot_dimension_numbers<[1], [0], [0], [1], [0, 0, 1, 1], [], []>} : vector<8x256xf32>, vector<256x128xf32>, vector<8x128xf32> -> vector<8x128xf32>
    %c0_18 = arith.constant 0 : index
    %c0_19 = arith.constant 0 : index
    %40 = vector.load %arg7[%c0_18, %c0_19] : memref<1x128xf32, #tpu.memory_space<vmem>>, vector<1x128xf32>
    %41 = vector.broadcast %40 : vector<1x128xf32> to vector<8x128xf32>
    %42 = arith.addf %39, %41 : vector<8x128xf32>
    %cst_20 = arith.constant -2.000000e+01 : f32
    %cst_21 = arith.constant 2.000000e+00 : f32
    %43 = vector.broadcast %cst_20 : f32 to vector<8x128xf32>
    %44 = arith.maximumf %43, %42 : vector<8x128xf32>
    %45 = vector.broadcast %cst_21 : f32 to vector<8x128xf32>
    %46 = arith.minimumf %45, %44 : vector<8x128xf32>
    %47 = math.exp %46 : vector<8x128xf32>
    %c0_22 = arith.constant 0 : index
    %c0_23 = arith.constant 0 : index
    %48 = vector.load %arg8[%c0_22, %c0_23] : memref<1x128xi32, #tpu.memory_space<vmem>>, vector<1x128xi32>
    %c0_i32 = arith.constant 0 : i32
    %49 = vector.broadcast %c0_i32 : i32 to vector<1x128xi32>
    %50 = arith.cmpi ne, %48, %49 : vector<1x128xi32>
    %51 = vector.shape_cast %50 : vector<1x128xi1> to vector<1x128xi1>
    %52 = vector.broadcast %51 : vector<1x128xi1> to vector<8x128xi1>
    %53 = arith.select %52, %47, %42 : vector<8x128xi1>, vector<8x128xf32>
    %c0_24 = arith.constant 0 : index
    %c0_25 = arith.constant 0 : index
    %54 = vector.load %arg9[%c0_24, %c0_25] : memref<8x128xf32, #tpu.memory_space<vmem>>, vector<8x128xf32>
    tpu.vector_store %arg9[%c0_24, %c0_25], %53 {strides = array<i32>} : memref<8x128xf32, #tpu.memory_space<vmem>>, vector<8x128xf32>,
    return
  }
  func.func @transform_0(%arg0: i32) -> (i32, i32) {
    %c0_i32 = arith.constant 0 : i32
    %c0_i32_0 = arith.constant 0 : i32
    return %arg0, %c0_i32 : i32, i32
  }
  func.func @transform_1(%arg0: i32) -> (i32, i32) {
    %c0_i32 = arith.constant 0 : i32
    %c0_i32_0 = arith.constant 0 : i32
    %c0_i32_1 = arith.constant 0 : i32
    return %c0_i32, %c0_i32_0 : i32, i32
  }
  func.func @transform_2(%arg0: i32) -> (i32, i32) {
    %c0_i32 = arith.constant 0 : i32
    %c0_i32_0 = arith.constant 0 : i32
    %c0_i32_1 = arith.constant 0 : i32
    return %c0_i32, %c0_i32_0 : i32, i32
  }
  func.func @transform_3(%arg0: i32) -> (i32, i32) {
    %c0_i32 = arith.constant 0 : i32
    %c0_i32_0 = arith.constant 0 : i32
    %c0_i32_1 = arith.constant 0 : i32
    return %c0_i32, %c0_i32_0 : i32, i32
  }
  func.func @transform_4(%arg0: i32) -> (i32, i32) {
    %c0_i32 = arith.constant 0 : i32
    %c0_i32_0 = arith.constant 0 : i32
    %c0_i32_1 = arith.constant 0 : i32
    return %c0_i32, %c0_i32_0 : i32, i32
  }
  func.func @transform_5(%arg0: i32) -> (i32, i32) {
    %c0_i32 = arith.constant 0 : i32
    %c0_i32_0 = arith.constant 0 : i32
    %c0_i32_1 = arith.constant 0 : i32
    return %c0_i32, %c0_i32_0 : i32, i32
  }
  func.func @transform_6(%arg0: i32) -> (i32, i32) {
    %c0_i32 = arith.constant 0 : i32
    %c0_i32_0 = arith.constant 0 : i32
    %c0_i32_1 = arith.constant 0 : i32
    return %c0_i32, %c0_i32_0 : i32, i32
  }
  func.func @transform_7(%arg0: i32) -> (i32, i32) {
    %c0_i32 = arith.constant 0 : i32
    %c0_i32_0 = arith.constant 0 : i32
    %c0_i32_1 = arith.constant 0 : i32
    return %c0_i32, %c0_i32_0 : i32, i32
  }
  func.func @transform_8(%arg0: i32) -> (i32, i32) {
    %c0_i32 = arith.constant 0 : i32
    %c0_i32_0 = arith.constant 0 : i32
    return %arg0, %c0_i32 : i32, i32
  }
}

</mosaic_0001>

<bundles_post_ra>
// kernel: tpu_custom_call.1
= control target key start
LH: loop header
LB: loop body
LE: loop exit
PB: predicated region body
PF: predicated region fallthrough
CT: control target
= control target key end

     0   :  { %13 = vsyncpa [#allocation3], 0  ;;  %s689_s0 = inlined_call_operand.vmem [shape: f32[8,4], index: 0, kind: input, shape index: {}]   ;;  %s690_s1 = inlined_call_operand.vmem [shape: f32[4,256], index: 1, kind: input, shape index: {}]   ;;  %s691_s2 = inlined_call_operand.vmem [shape: f32[1,256], index: 2, kind: input, shape index: {}]   ;;  %s692_s3 = inlined_call_operand.hbm [shape: f32[256,256], index: 3, kind: input, shape index: {}]   ;;  %s693_s4 = inlined_call_operand.vmem [shape: f32[1,256], index: 4, kind: input, shape index: {}]   ;;  %s694_s5 = inlined_call_operand.hbm [shape: f32[256,128], index: 5, kind: input, shape index: {}]   ;;  %s695_s6 = inlined_call_operand.vmem [shape: f32[1,128], index: 6, kind: input, shape index: {}]   ;;  %s696_s7 = inlined_call_operand.vmem [shape: s32[1,128], index: 7, kind: input, shape index: {}]   ;;  %s697_s8 = inlined_call_operand.hbm [shape: f32[8,128], index: 8, kind: output, shape index: {}]  }
   0x1   :  { %14 = vsyncpa [#allocation6], 0 }
   0x2   :  { %15 = vsyncpa [#allocation4], 0  ;;  %s570_s27 = smov [#allocation2]  }
   0x3   :  { %s27_s28 = sshll.u32 %s570_s27, 4  ;;  %s28_s28 = int_to_ptr.vmem [resolvable:$true] %s27_s28 }
   0x4   :  { %s512_s29 = scalar_lea.vmem %s28_s28, 8192  ;;  %p517_p1 = scmp.lt.s32.totalorder %s28_s28, %s28_s28 }
   0x5   :  { %p513_p0 = scmp.ne.s32.totalorder %s28_s28, %s512_s29  ;;  %p518_p2 = scmp.lt.s32.totalorder %s512_s29, %s512_s29 }
   0x7   :  { %p519_p3 = por %p518_p2, %p517_p1 }
   0x9   :  { %p520_p4 = pnand %p519_p3, %p513_p0 }
   0xb   :  { %523 = shalt.err (!%p520_p4)
}
   0xc   :  { %s571_s30 = smov 256   ;;  %s572_s9 = smov 16  }
   0xd   :  { %33 = dma.hbm_to_vmem [thread:$0]  %s692_s3, 8192, %s28_s28, [#allocation3], %s571_s30, %s571_s30, %s572_s9  }
   0xe   :  { %s573_s12 = smov [#allocation5]  }
   0xf   :  { %s41_s13 = sshll.u32 %s573_s12, 4  ;;  %s42_s13 = int_to_ptr.vmem [resolvable:$true] %s41_s13 }
  0x10   :  { %s532_s14 = scalar_lea.vmem %s42_s13, 4096  ;;  %p537_p6 = scmp.lt.s32.totalorder %s42_s13, %s42_s13 }
  0x11   :  { %p533_p5 = scmp.ne.s32.totalorder %s42_s13, %s532_s14  ;;  %p538_p7 = scmp.lt.s32.totalorder %s532_s14, %s532_s14 }
  0x13   :  { %p539_p8 = por %p538_p7, %p537_p6 }
  0x15   :  { %p540_p9 = pnand %p539_p8, %p533_p5 }
  0x17   :  { %543 = shalt.err (!%p540_p9)
}
  0x18   :  { %s574_s15 = smov 128   ;;  %s575_s16 = smov 8  }
  0x19   :  { %47 = dma.hbm_to_vmem [thread:$0]  %s694_s5, 4096, %s42_s13, [#allocation6], %s574_s15, %s574_s15, %s575_s16  }
  0x1a   :  { %564 = dma.done.wait [#allocation3], 8192  }
  0x1b   :  { %565 = vsyncadd [#allocation3], 4294959104 }
  0x1c   :  { %566 = dma.done.wait [#allocation6], 4096  }
  0x1d   :  { %567 = vsyncadd [#allocation6], 4294963200  ;;  %v66_v0 = vlaneseq  ;;  %v576_v1 = vmov 0   ;;  %v577_v2 = vmov 2   ;;  %v421_v4 = vld [vmem:[%s696_s7] sm:$0x1] }
  0x1e   :  { %497 = vset.pattern.permute.xlu0 %v576_v1  ;;  %499 = vset.pattern.permute.xlu1 %v577_v2  ;;  %v58_v5 = vld [vmem:[%s689_s0] sm:$0xff]  ;;  %v190_v6 = vld [vmem:[#allocation2 + $0xf8] sm:$0xff]  ;;  %vm422_vm0 = vcmp.ne.s32.totalorder %v421_v4, 0  ;;  %v189_v8 = vld [vmem:[#allocation2 + $0xf0] sm:$0xff]  ;;  %v578_v13 = vmov 1   ;;  %v579_v14 = vmov 3  }
  0x1f   :  { %v632_v3 = vshrl.u32 %v66_v0, 7  ;;  %62 = vperm.xlu0 %497, %v58_v5   ;;  %104 = vperm.xlu1 %499, %v58_v5   ;;  %v188_v9 = vld [vmem:[#allocation2 + $0xe8] sm:$0xff]  ;;  %v643_v10 = vsel %vm422_vm0, 1, %v576_v1  ;;  %v187_v12 = vld [vmem:[#allocation2 + $0xe0] sm:$0xff]  ;;  %v186_v15 = vld [vmem:[#allocation2 + $0xd8] sm:$0xff] }
  0x20   :  { %235 = vmatprep.subr.mxu0 %v190_v6  ;;  %v185_v16 = vld [vmem:[#allocation2 + $0xd0] sm:$0xff]  ;;  %v184_v17 = vld [vmem:[#allocation2 + $0xc8] sm:$0xff]  ;;  %v183_v18 = vld [vmem:[#allocation2 + $0xc0] sm:$0xff] }
  0x21   :  { %v641_v7 = vsub.s32 0, %v632_v3  ;;  %236 = vmatpush1.msra.mxu0 %v189_v8  ;;  %v182_v19 = vld [vmem:[#allocation2 + $0xb8] sm:$0xff]  ;;  %v181_v20 = vld [vmem:[#allocation2 + $0xb0] sm:$0xff]  ;;  %v180_v21 = vld [vmem:[#allocation2 + $0xa8] sm:$0xff] }
  0x22   :  { %237 = vmatprep.subr.mxu0 %v188_v9  ;;  %v179_v22 = vld [vmem:[#allocation2 + $0xa0] sm:$0xff]  ;;  %v178_v23 = vld [vmem:[#allocation2 + $0x98] sm:$0xff]  ;;  %v177_v24 = vld [vmem:[#allocation2 + $0x90] sm:$0xff] }
  0x23   :  { %v427_v11 = vrot.slane %v643_v10, %v641_v7  ;;  %498 = vset.pattern.permute.xlu0 %v578_v13  ;;  %500 = vset.pattern.permute.xlu1 %v579_v14  ;;  %v176_v25 = vld [vmem:[#allocation2 + $0x88] sm:$0xff]  ;;  %v175_v26 = vld [vmem:[#allocation2 + $0x80] sm:$0xff]  ;;  %v174_v27 = vld [vmem:[#allocation2 + $0x78] sm:$0xff] }
  0x24   :  { %83 = vperm.xlu0 %498, %v58_v5   ;;  %125 = vperm.xlu1 %500, %v58_v5   ;;  %v173_v28 = vld [vmem:[#allocation2 + $0x70] sm:$0xff]  ;;  %v172_v29 = vld [vmem:[#allocation2 + $0x68] sm:$0xff]  ;;  %v171_v30 = vld [vmem:[#allocation2 + $0x60] sm:$0xff] }
  0x25   :  { %238 = vmatpush1.msra.mxu0 %v187_v12  ;;  %v170_v31 = vld [vmem:[#allocation2 + $0x58] sm:$0xff]  ;;  %v169_v32 = vld [vmem:[#allocation2 + $0x50] sm:$0xff]  ;;  %v168_v33 = vld [vmem:[#allocation2 + $0x48] sm:$0xff]  ;;  %vm428_vm1 = vcmp.eq.s32.totalorder %v427_v11, 1 }
  0x26   :  { %239 = vmatprep.subr.mxu0 %v186_v15  ;;  %v167_v34 = vld [vmem:[#allocation2 + $0x40] sm:$0xff]  ;;  %v339_v35 = vld [vmem:[#allocation5 + $0xf8] sm:$0xff]  ;;  %v338_v37 = vld [vmem:[#allocation5 + $0xf0] sm:$0xff] }
  0x27   :  { %240 = vmatpush1.msra.mxu0 %v185_v16  ;;  %451 = vmatprep.subr.mxu1 %v339_v35  ;;  %v323_v36 = vld [vmem:[#allocation5 + $0x78] sm:$0xff]  ;;  %v322_v38 = vld [vmem:[#allocation5 + $0x70] sm:$0xff]  ;;  %v337_v40 = vld [vmem:[#allocation5 + $0xe8] sm:$0xff] }
  0x28   :  { %241 = vmatprep.subr.mxu0 %v184_v17  ;;  %501 = vset.pattern.permute.xlu0 %v579_v14  ;;  %v166_v39 = vld [vmem:[#allocation2 + $0x38] sm:$0xff]  ;;  %v165_v41 = vld [vmem:[#allocation2 + $0x30] sm:$0xff]  ;;  %v321_v42 = vld [vmem:[#allocation5 + $0x68] sm:$0xff] }
  0x29   :  { %242 = vmatpush1.msra.mxu0 %v183_v18  ;;  %452 = vmatpush3.msra.mxu1 %v323_v36  ;;  %v164_v43 = vld [vmem:[#allocation2 + $0x28] sm:$0xff]  ;;  %v336_v44 = vld [vmem:[#allocation5 + $0xe0] sm:$0xff]  ;;  %v162_v47 = vld [vmem:[#allocation2 + $0x18] sm:$0xff] }
  0x2a   :  { %243 = vmatprep.subr.mxu0 %v182_v19  ;;  %453 = vmatprep.subr.mxu1 %v338_v37  ;;  %v163_v45 = vld [vmem:[#allocation2 + $0x20] sm:$0xff]  ;;  %v335_v48 = vld [vmem:[#allocation5 + $0xd8] sm:$0xff]  ;;  %v161_v49 = vld [vmem:[#allocation2 + $0x10] sm:$0xff] }
  0x2b   :  { %244 = vmatpush1.msra.mxu0 %v181_v20  ;;  %454 = vmatpush3.msra.mxu1 %v322_v38  ;;  %v320_v46 = vld [vmem:[#allocation5 + $0x60] sm:$0xff]  ;;  %v319_v50 = vld [vmem:[#allocation5 + $0x58] sm:$0xff]  ;;  %v160_v51 = vld [vmem:[#allocation2 + $0x8] sm:$0xff] }
  0x2c   :  { %245 = vmatprep.subr.mxu0 %v180_v21  ;;  %455 = vmatprep.subr.mxu1 %v337_v40  ;;  %v334_v52 = vld [vmem:[#allocation5 + $0xd0] sm:$0xff]  ;;  %v159_v53 = vld [vmem:[#allocation2] sm:$0xff]  ;;  %v222_v55 = vld [vmem:[#allocation2 + $0x1f8] sm:$0xff] }
  0x2d   :  { %246 = vmatpush1.msra.mxu0 %v179_v22  ;;  %456 = vmatpush3.msra.mxu1 %v321_v42  ;;  %v318_v54 = vld [vmem:[#allocation5 + $0x50] sm:$0xff]  ;;  %v333_v56 = vld [vmem:[#allocation5 + $0xc8] sm:$0xff]  ;;  %v332_v60 = vld [vmem:[#allocation5 + $0xc0] sm:$0xff] }
  0x2e   :  { %247 = vmatprep.subr.mxu0 %v178_v23  ;;  %457 = vmatprep.subr.mxu1 %v336_v44  ;;  %v221_v57 = vld [vmem:[#allocation2 + $0x1f0] sm:$0xff]  ;;  %v317_v58 = vld [vmem:[#allocation5 + $0x48] sm:$0xff]  ;;  %v219_v61 = vld [vmem:[#allocation2 + $0x1e0] sm:$0xff] }
  0x2f   :  { %248 = vmatpush1.msra.mxu0 %v177_v24  ;;  %458 = vmatpush3.msra.mxu1 %v320_v46  ;;  %v220_v59 = vld [vmem:[#allocation2 + $0x1e8] sm:$0xff]  ;;  %v316_v62 = vld [vmem:[#allocation5 + $0x40] sm:$0xff]  ;;  %v218_v63 = vld [vmem:[#allocation2 + $0x1d8] sm:$0xff] }
  0x30   :  { %249 = vmatprep.subr.mxu0 %v176_v25  ;;  %459 = vmatprep.subr.mxu1 %v335_v48  ;;  %v331_v0 = vld [vmem:[#allocation5 + $0xb8] sm:$0xff]  ;;  %v217_v1 = vld [vmem:[#allocation2 + $0x1d0] sm:$0xff]  ;;  %v216_v4 = vld [vmem:[#allocation2 + $0x1c8] sm:$0xff] }
  0x31   :  { %250 = vmatpush1.msra.mxu0 %v175_v26  ;;  %460 = vmatpush3.msra.mxu1 %v319_v50  ;;  %v315_v2 = vld [vmem:[#allocation5 + $0x38] sm:$0xff]  ;;  %v330_v5 = vld [vmem:[#allocation5 + $0xb0] sm:$0xff]  ;;  %v215_v6 = vld [vmem:[#allocation2 + $0x1c0] sm:$0xff] }
  0x32   :  { %251 = vmatprep.subr.mxu0 %v174_v27  ;;  %461 = vmatprep.subr.mxu1 %v334_v52  ;;  %v314_v8 = vld [vmem:[#allocation5 + $0x30] sm:$0xff]  ;;  %v214_v9 = vld [vmem:[#allocation2 + $0x1b8] sm:$0xff]  ;;  %v329_v12 = vld [vmem:[#allocation5 + $0xa8] sm:$0xff] }
  0x33   :  { %252 = vmatpush1.msra.mxu0 %v173_v28  ;;  %462 = vmatpush3.msra.mxu1 %v318_v54  ;;  %v213_v13 = vld [vmem:[#allocation2 + $0x1b0] sm:$0xff]  ;;  %v313_v14 = vld [vmem:[#allocation5 + $0x28] sm:$0xff]  ;;  %v328_v16 = vld [vmem:[#allocation5 + $0xa0] sm:$0xff] }
  0x34   :  { %253 = vmatprep.subr.mxu0 %v172_v29  ;;  %463 = vmatprep.subr.mxu1 %v333_v56  ;;  %v212_v15 = vld [vmem:[#allocation2 + $0x1a8] sm:$0xff]  ;;  %v211_v17 = vld [vmem:[#allocation2 + $0x1a0] sm:$0xff]  ;;  %v210_v19 = vld [vmem:[#allocation2 + $0x198] sm:$0xff] }
  0x35   :  { %254 = vmatpush1.msra.mxu0 %v171_v30  ;;  %464 = vmatpush3.msra.mxu1 %v317_v58  ;;  %v312_v18 = vld [vmem:[#allocation5 + $0x20] sm:$0xff]  ;;  %v209_v20 = vld [vmem:[#allocation2 + $0x190] sm:$0xff]  ;;  %v208_v21 = vld [vmem:[#allocation2 + $0x188] sm:$0xff] }
  0x36   :  { %255 = vmatprep.subr.mxu0 %v170_v31  ;;  %465 = vmatprep.subr.mxu1 %v332_v60  ;;  %v207_v22 = vld [vmem:[#allocation2 + $0x180] sm:$0xff]  ;;  %v206_v23 = vld [vmem:[#allocation2 + $0x178] sm:$0xff]  ;;  %v205_v24 = vld [vmem:[#allocation2 + $0x170] sm:$0xff] }
  0x37   :  { %256 = vmatpush1.msra.mxu0 %v169_v32  ;;  %466 = vmatpush3.msra.mxu1 %v316_v62  ;;  %v204_v25 = vld [vmem:[#allocation2 + $0x168] sm:$0xff]  ;;  %v203_v26 = vld [vmem:[#allocation2 + $0x160] sm:$0xff]  ;;  %v202_v27 = vld [vmem:[#allocation2 + $0x158] sm:$0xff] }
  0x38   :  { %257 = vmatprep.subr.mxu0 %v168_v33  ;;  %467 = vmatprep.subr.mxu1 %v331_v0  ;;  %v201_v28 = vld [vmem:[#allocation2 + $0x150] sm:$0xff]  ;;  %v200_v29 = vld [vmem:[#allocation2 + $0x148] sm:$0xff]  ;;  %v199_v30 = vld [vmem:[#allocation2 + $0x140] sm:$0xff] }
  0x39   :  { %258 = vmatpush1.msra.mxu0 %v167_v34  ;;  %468 = vmatpush3.msra.mxu1 %v315_v2  ;;  %v198_v31 = vld [vmem:[#allocation2 + $0x138] sm:$0xff]  ;;  %v197_v32 = vld [vmem:[#allocation2 + $0x130] sm:$0xff]  ;;  %v196_v33 = vld [vmem:[#allocation2 + $0x128] sm:$0xff] }
  0x3a   :  { %259 = vmatprep.subr.mxu0 %v166_v39  ;;  %469 = vmatprep.subr.mxu1 %v330_v5  ;;  %v195_v34 = vld [vmem:[#allocation2 + $0x120] sm:$0xff]  ;;  %v194_v35 = vld [vmem:[#allocation2 + $0x118] sm:$0xff]  ;;  %v193_v36 = vld [vmem:[#allocation2 + $0x110] sm:$0xff]  ;;  %v648_v39 = vsub.s32 1, %v632_v3 }
  0x3b   :  { %260 = vmatpush1.msra.mxu0 %v165_v41  ;;  %470 = vmatpush3.msra.mxu1 %v314_v8  ;;  %v192_v37 = vld [vmem:[#allocation2 + $0x108] sm:$0xff]  ;;  %v191_v38 = vld [vmem:[#allocation2 + $0x100] sm:$0xff] }
  0x3c   :  { %261 = vmatprep.subr.mxu0 %v164_v43  ;;  %471 = vmatprep.subr.mxu1 %v329_v12  ;;  %v59_v40 = vld [vmem:[%s690_s1] ss:$4 sm:$0x3]  ;;  %v447_v41 = vld [vmem:[%s690_s1 + $0x1] ss:$4 sm:$0x3] }
  0x3d   :  { %262 = vmatpush1.msra.mxu0 %v163_v45  ;;  %472 = vmatpush3.msra.mxu1 %v313_v14  ;;  %v448_v43 = vld [vmem:[%s690_s1 + $0x2] ss:$4 sm:$0x3]  ;;  %v449_v45 = vld [vmem:[%s690_s1 + $0x3] ss:$4 sm:$0x3]  ;;  %v69_v3 = vrot.slane %v59_v40, %v641_v7  ;;  %v73_v46 = vrot.slane %v59_v40, %v648_v39  ;;  %v94_v48 = vrot.slane %v447_v41, %v648_v39 }
  0x3e   :  { %263 = vmatprep.subr.mxu0 %v162_v47  ;;  %473 = vmatprep.subr.mxu1 %v328_v16  ;;  %v90_v47 = vrot.slane %v447_v41, %v641_v7  ;;  %v115_v50 = vrot.slane %v448_v43, %v648_v39  ;;  %v136_v52 = vrot.slane %v449_v45, %v648_v39  ;;  %v327_v16 = vld [vmem:[#allocation5 + $0x98] sm:$0xff] }
  0x3f   :  { %264 = vmatpush1.msra.mxu0 %v161_v49  ;;  %474 = vmatpush3.msra.mxu1 %v312_v18  ;;  %v111_v49 = vrot.slane %v448_v43, %v641_v7  ;;  %v326_v18 = vld [vmem:[#allocation5 + $0x90] sm:$0xff] }
  0x40   :  { %265 = vmatprep.subr.mxu0 %v160_v51  ;;  %v132_v51 = vrot.slane %v449_v45, %v641_v7  ;;  %475 = vmatprep.subr.mxu1 %v327_v16 }
  0x41   :  { %266 = vmatpush1.msra.mxu0 %v159_v53 }
  0x42   :  { %267 = vmatprep.subr.mxu0 %v222_v55 }
  0x43   :  { %268 = vmatpush2.msra.mxu0 %v221_v57 }
  0x44   :  { %269 = vmatprep.subr.mxu0 %v220_v59 }
  0x45   :  { %270 = vmatpush2.msra.mxu0 %v219_v61  ;;  %v143_v61 = vld [vmem:[%s691_s2] sm:$0x3] }
  0x46   :  { %271 = vmatprep.subr.mxu0 %v218_v63  ;;  %v148_v5 = vrot.slane %v143_v61, %v641_v7 }
  0x47   :  { %272 = vmatpush2.msra.mxu0 %v217_v1 }
  0x48   :  { %273 = vmatprep.subr.mxu0 %v216_v4 }
  0x49   :  { %274 = vmatpush2.msra.mxu0 %v215_v6  ;;  %v152_v6 = vrot.slane %v143_v61, %v648_v39 }
  0x4a   :  { %275 = vmatprep.subr.mxu0 %v214_v9 }
  0x4b   :  { %276 = vmatpush2.msra.mxu0 %v213_v13 }
  0x4c   :  { %277 = vmatprep.subr.mxu0 %v212_v15 }
  0x4d   :  { %278 = vmatpush2.msra.mxu0 %v211_v17  ;;  %v311_v17 = vld [vmem:[#allocation5 + $0x18] sm:$0xff] }
  0x4e   :  { %279 = vmatprep.subr.mxu0 %v210_v19  ;;  %476 = vmatpush3.msra.mxu1 %v311_v17  ;;  %v310_v19 = vld [vmem:[#allocation5 + $0x10] sm:$0xff] }
  0x4f   :  { %280 = vmatpush2.msra.mxu0 %v209_v20  ;;  %477 = vmatprep.subr.mxu1 %v326_v18  ;;  %v325_v20 = vld [vmem:[#allocation5 + $0x88] sm:$0xff] }
  0x50   :  { %281 = vmatprep.subr.mxu0 %v208_v21  ;;  %478 = vmatpush3.msra.mxu1 %v310_v19  ;;  %v309_v21 = vld [vmem:[#allocation5 + $0x8] sm:$0xff] }
  0x51   :  { %282 = vmatpush2.msra.mxu0 %v207_v22  ;;  %v324_v22 = vld [vmem:[#allocation5 + $0x80] sm:$0xff]  ;;  %479 = vmatprep.subr.mxu1 %v325_v20 }
  0x52   :  { %283 = vmatprep.subr.mxu0 %v206_v23  ;;  %v308_v23 = vld [vmem:[#allocation5] sm:$0xff]  ;;  %480 = vmatpush3.msra.mxu1 %v309_v21 }
  0x53   :  { %284 = vmatpush2.msra.mxu0 %v205_v24  ;;  %481 = vmatprep.subr.mxu1 %v324_v22  ;;  %v223_v24 = vld [vmem:[%s693_s4] sm:$0x3]  ;;  %s580_s4 = smov [#allocation7]  }
  0x54   :  { %285 = vmatprep.subr.mxu0 %v204_v25  ;;  %482 = vmatpush3.msra.mxu1 %v308_v23  ;;  %v228_v25 = vrot.slane %v223_v24, %v641_v7  ;;  %s437_s9 = sshll.u32 %s580_s4, 4  ;;  %s438_s9 = int_to_ptr.vmem [resolvable:$true] %s437_s9 }
  0x55   :  { %286 = vmatpush2.msra.mxu0 %v203_v26  ;;  %v232_v26 = vrot.slane %v223_v24, %v648_v39  ;;  %s544_s10 = scalar_lea.vmem %s438_s9, 128  ;;  %p549_p11 = scmp.lt.s32.totalorder %s438_s9, %s438_s9 }
  0x56   :  { %287 = vmatprep.subr.mxu0 %v202_v27  ;;  %p545_p10 = scmp.ne.s32.totalorder %s438_s9, %s544_s10  ;;  %p550_p12 = scmp.lt.s32.totalorder %s544_s10, %s544_s10 }
  0x57   :  { %288 = vmatpush2.msra.mxu0 %v201_v28 }
  0x58   :  { %289 = vmatprep.subr.mxu0 %v200_v29  ;;  %p551_p13 = por %p550_p12, %p549_p11 }
  0x59   :  { %290 = vmatpush2.msra.mxu0 %v199_v30 }
  0x5a   :  { %291 = vmatprep.subr.mxu0 %v198_v31  ;;  %p552_p0 = pnand %p551_p13, %p545_p10 }
  0x5b   :  { %292 = vmatpush2.msra.mxu0 %v197_v32 }
  0x5c   :  { %293 = vmatprep.subr.mxu0 %v196_v33 }
  0x5d   :  { %294 = vmatpush2.msra.mxu0 %v195_v34  ;;  %v450_v34 = vld [vmem:[%s695_s6] ss:$0 sm:$0xff] }
  0x5e   :  { %295 = vmatprep.subr.mxu0 %v194_v35 }
  0x5f   :  { %296 = vmatpush2.msra.mxu0 %v193_v36 }
  0x60   :  { %297 = vmatprep.subr.mxu0 %v192_v37 }
  0x61   :  { %298 = vmatpush2.msra.mxu0 %v191_v38 }
  0x9a   :  { %v63_v42 = vpop.permute.xlu0 %62  ;;  %v105_v44 = vpop.permute.xlu1 %104 }
  0x9b   :  { %v76_v55 = vmul.f32 %v69_v3, %v63_v42  ;;  %v77_v56 = vmul.f32 %v73_v46, %v63_v42  ;;  %v118_v59 = vmul.f32 %v111_v49, %v105_v44  ;;  %v119_v60 = vmul.f32 %v115_v50, %v105_v44 }
  0x9f   :  { %v84_v53 = vpop.permute.xlu0 %83  ;;  %v126_v54 = vpop.permute.xlu1 %125 }
  0xa0   :  { %v97_v57 = vmul.f32 %v90_v47, %v84_v53  ;;  %v98_v58 = vmul.f32 %v94_v48, %v84_v53  ;;  %v139_v0 = vmul.f32 %v132_v51, %v126_v54  ;;  %v140_v1 = vmul.f32 %v136_v52, %v126_v54 }
  0xa2   :  { %v99_v62 = vadd.f32 %v97_v57, %v76_v55  ;;  %v100_v63 = vadd.f32 %v98_v58, %v77_v56 }
  0xa4   :  { %v120_v2 = vadd.f32 %v118_v59, %v99_v62  ;;  %v121_v4 = vadd.f32 %v119_v60, %v100_v63 }
  0xa6   :  { %v141_v8 = vadd.f32 %v139_v0, %v120_v2  ;;  %v142_v9 = vadd.f32 %v140_v1, %v121_v4 }
  0xa8   :  { %v156_v12 = vadd.f32 %v152_v6, %v142_v9  ;;  %v155_v13 = vadd.f32 %v148_v5, %v141_v8 }
  0xaa   :  { %v158_v14 = vmax.f32 %v156_v12, 0.0  ;;  %v157_v15 = vmax.f32 %v155_v13, 0.0 }
  0xac   :  { %299 = vmatprep.mubr.f32.mxu0 %v158_v14 }
  0xad   :  { %300 = vmatmul.mubr.f32.vlgmr.msra.gmra.mxu0 %v157_v15 }
 0x16d   :  { %v301_v27 = vpop.f32.mrf.mxu0 }
 0x16e   :  { %v302_v28 = vadd.f32 %v301_v27, %v228_v25 }
 0x16f   :  { %v303_v29 = vpop.f32.mrf.mxu0 }
 0x170   :  { %v304_v30 = vadd.f32 %v303_v29, %v232_v26  ;;  %v306_v32 = vmax.f32 %v302_v28, 0.0 }
 0x172   :  { %v307_v31 = vmax.f32 %v304_v30, 0.0 }
 0x174   :  { %411 = vmatprep.mubr.f32.mxu1 %v307_v31 }
 0x175   :  { %412 = vmatmul.mubr.f32.vlgmr.msra.gmra.mxu1 %v306_v32 }
 0x235   :  { %v483_v33 = vpop.f32.mrf.mxu1 }
 0x237   :  { %v484_v35 = vpop.f32.mrf.mxu1 }
 0x238   :  { %v485_v36 = vadd.f32 %v484_v35, %v483_v33 }
 0x23a   :  { %v414_v37 = vadd.f32 %v485_v36, %v450_v34 }
 0x23c   :  { %v417_v38 = vmax.f32 %v414_v37, -20.0 }
 0x23e   :  { %v418_v40 = vmin.f32 %v417_v38, 2.0 }
 0x240   :  { %v419_v41 = vmul.f32 1.442695, %v418_v40 }
 0x242   :  { %502 = vpow2.f32 %v419_v41 }
 0x24f   :  { %v503_v39 = vpop.eup %502 }
 0x250   :  { %v429_v42 = vsel %vm428_vm1, %v503_v39, %v414_v37 }
 0x251   :  { %430 = vst [vmem:[#allocation7] sm:$0xff] %v429_v42 }
 0x252   :  { %555 = shalt.err (!%p552_p0)
}
 0x253   :  { %440 = dma.vmem_to_hbm [thread:$0]  %s438_s9, 128, %s697_s8, [#allocation4]  }
 0x254   :  { %568 = dma.done.wait [#allocation4], 128  }
 0x255   :  { %569 = vsyncadd [#allocation4], 4294967168 }
 0x256   :  { %444 = vsyncpa [#allocation3], 1 }
 0x257   :  { %445 = vsyncpa [#allocation6], 1 }
 0x258   :  { %446 = vsyncpa [#allocation4], 1 }

</bundles_post_ra>
